<compile_context>
chip_gen: v7x
topology: tpu7x:2x2x1
jax: 0.10.0
libtpu: 0.0.40
codegen_flags: <defaults>
</compile_context>

<pallas_src>
import functools

import jax
import jax.numpy as jnp
from jax.experimental import pallas as pl
from jax.experimental.pallas import tpu as pltpu

_MIB = 1 << 20


def _make_kernel(bt: int):
    def _kernel(x_ref, w_ref, b_ref, o_ref):
        # x_ref : (bt, C_in, ts)   activation tile (lanes = flattened spatial)
        # w_ref : (C_out, C_in)    1x1 conv weight (VMEM resident)
        # b_ref : (C_out, 1)       bias column (free VPU broadcast over lanes)
        # o_ref : (bt, C_out, ts)
        w = w_ref[...]
        bias = b_ref[...]
        for i in range(bt):  # bt is a small compile-time constant
            o_ref[i] = (
                jnp.dot(w, x_ref[i], preferred_element_type=jnp.float32) + bias
            ).astype(o_ref.dtype)

    return _kernel


def _round_up(n: int, m: int) -> int:
    return ((n + m - 1) // m) * m


def _tpu_generation() -> str:
    try:
        kind = jax.devices()[0].device_kind.lower()
    except Exception:
        kind = ""
    if "v7" in kind:
        return "v7x"
    if "v6" in kind:
        return "v6e"
    if "v5 lite" in kind or "v5e" in kind or "v5lite" in kind:
        return "v5e"
    return "other"


# generation -> (tile working-set budget, lane-tile cap, vmem_limit_bytes)
_GEN_POLICY = {
    # v7x: only 64 MiB physical VMEM -> keep pipelined working set small.
    "v7x": (36 * _MIB, 4096, 48 * _MIB),
    # v6e: 128 MiB VMEM; big lane tiles reach ~85% of the HBM roofline.
    "v6e": (72 * _MIB, 8192, 100 * _MIB),
    # v5e: ~0.82 TB/s HBM saturates at moderate tiles; keep VMEM use modest.
    "v5e": (40 * _MIB, 1024, 64 * _MIB),
    "other": (40 * _MIB, 2048, 64 * _MIB),
}


def _footprint_bytes(bt, c_in, c_out, ts, itemsize, w_bufs):
    """VMEM working set of the pipelined kernel (sublane-padded estimate)."""
    c_in8, c_out8 = _round_up(c_in, 8), _round_up(c_out, 8)
    act = 2 * bt * c_in8 * ts * itemsize        # double-buffered input tiles
    out = 2 * bt * c_out8 * ts * itemsize       # double-buffered output tiles
    wgt = w_bufs * (c_out8 * c_in8 + c_out8 * 128) * itemsize  # weight + bias
    return act + out + wgt


def _pick_tiles(b, c_in, c_out, hw_padded, itemsize, budget, ts_cap, w_bufs):
    """VMEM-budget-driven lane-tile and batch-block choice."""
    # Largest lane tile (multiple of 128, divides padded H*W, <= cap) whose
    # double-buffered working set fits the budget.
    ts = 128
    for cand in range(min(ts_cap, hw_padded), 127, -128):
        if hw_padded % cand == 0 and (
            _footprint_bytes(1, c_in, c_out, cand, itemsize, w_bufs) <= budget
        ):
            ts = cand
            break
    # If the whole spatial extent fits in a single tile, block batch rows per
    # grid step to amortize per-step overhead -- but keep >= 2 grid steps when
    # possible so both v7x TensorCores get work.
    bt = 1
    if ts == hw_padded and b > 1:
        for cand in range(b // 2, 0, -1):
            if b % cand == 0 and (
                _footprint_bytes(cand, c_in, c_out, ts, itemsize, w_bufs)
                <= budget
            ):
                bt = cand
                break
    return bt, ts


def linear_forward(x, w, b, *, compute_dtype=None, single_buffer_consts=True):
    """Conv2d(c_in, c_out, kernel_size=(1,1), bias=True) forward.

    x: (B, C_in, H, W)
    w: (C_out, C_in) or PyTorch conv weight (C_out, C_in, 1, 1)
    b: (C_out,)
    compute_dtype: optional lower-precision dtype (e.g. jnp.bfloat16) for x/w
        to halve HBM read traffic on this bandwidth-bound op; accumulation,
        bias and output stay float32.
    returns (B, C_out, H, W) float32
    """
    if w.ndim == 4:
        w = w.reshape(w.shape[0], w.shape[1])
    B, C_in, H, W = x.shape
    C_out = w.shape[0]
    HW = H * W
    HWp = _round_up(HW, 128)  # lane-dense padding -> unmasked stores

    if compute_dtype is not None:
        x = x.astype(compute_dtype)
        w = w.astype(compute_dtype)
    itemsize = jnp.dtype(x.dtype).itemsize

    gen = _tpu_generation()
    budget, ts_cap, vmem_ceiling = _GEN_POLICY[gen]
    w_bufs = 1 if single_buffer_consts else 2
    bt, ts = _pick_tiles(B, C_in, C_out, HWp, itemsize, budget, ts_cap, w_bufs)
    n_b, n_sp = B // bt, HWp // ts

    x_flat = x.reshape(B, C_in, HW)
    if HWp != HW:
        x_flat = jnp.pad(x_flat, ((0, 0), (0, 0), (0, HWp - HW)))
    b_col = b.astype(jnp.float32).reshape(C_out, 1)

    const_kwargs = {}
    if single_buffer_consts:
        # Weight/bias never change across the grid; a second pipeline buffer
        # would only waste VMEM better spent on bigger activation tiles.
        const_kwargs = dict(pipeline_mode=pl.Buffered(1))

    flops = 2 * B * HW * C_in * C_out
    bytes_accessed = (
        itemsize * B * C_in * HW      # activations read
        + 4 * B * C_out * HW          # f32 output written
        + itemsize * C_in * C_out     # weights
        + 4 * C_out                   # bias
    )
    vmem_limit = int(
        max(
            vmem_ceiling,
            _footprint_bytes(bt, C_in, C_out, ts, itemsize, w_bufs) * 4 // 3,
        )
    )

    out_flat = pl.pallas_call(
        _make_kernel(bt),
        out_shape=jax.ShapeDtypeStruct((B, C_out, HWp), jnp.float32),
        grid=(n_b, n_sp),
        in_specs=[
            pl.BlockSpec((bt, C_in, ts), lambda bb, ss: (bb, 0, ss)),
            pl.BlockSpec((C_out, C_in), lambda bb, ss: (0, 0), **const_kwargs),
            pl.BlockSpec((C_out, 1), lambda bb, ss: (0, 0), **const_kwargs),
        ],
        out_specs=pl.BlockSpec((bt, C_out, ts), lambda bb, ss: (bb, 0, ss)),
        compiler_params=pltpu.CompilerParams(
            dimension_semantics=("parallel", "parallel"),
            vmem_limit_bytes=vmem_limit,
        ),
        cost_estimate=pl.CostEstimate(
            flops=flops, transcendentals=0, bytes_accessed=bytes_accessed
        ),
    )(x_flat, w, b_col)

    if HWp != HW:
        out_flat = out_flat[..., :HW]  # drop padded lanes before exposing
    return out_flat.reshape(B, C_out, H, W)


if __name__ == "__main__":
    # Small shapes consistent with the module: x (B, C_in, H, W).
    B, C_IN, C_OUT, H, W = 2, 4, 8, 16, 16

    key = jax.random.PRNGKey(0)
    kx, kw, kb = jax.random.split(key, 3)
    x = jax.random.normal(kx, (B, C_IN, H, W), jnp.float32)
    w = 0.1 * jax.random.normal(kw, (C_OUT, C_IN), jnp.float32)
    b = 0.1 * jax.random.normal(kb, (C_OUT,), jnp.float32)

    def run(single_buffer_consts: bool):
        fn = jax.jit(
            functools.partial(
                linear_forward, single_buffer_consts=single_buffer_consts
            )
        )
        return jax.block_until_ready(fn(x, w, b))

    try:
        out = run(True)
    except Exception:
        # Single-buffered constants (pl.Buffered(1)) unsupported on this
        # JAX/backend combo -- fall back to default double buffering.
        out = run(False)

    # Reference: Conv2d 1x1 == channel einsum + bias broadcast.
    ref = jnp.einsum("oc,bchw->bohw", w, x) + b[None, :, None, None]

    assert out.shape == (B, C_OUT, H, W) and out.dtype == jnp.float32
    assert jnp.allclose(out, ref, atol=1e-5, rtol=1e-5), (
        float(jnp.max(jnp.abs(out - ref)))
    )
    print("KERNEL_OK")
</pallas_src>

<mosaic_0001>
module attributes {stable_mosaic.version = 11 : i64} {
  func.func @_kernel(%arg0: i32, %arg1: i32, %arg2: memref<1x4x256xf32, #tpu.memory_space<vmem>>, %arg3: memref<8x4xf32, #tpu.memory_space<vmem>>, %arg4: memref<8x1xf32, #tpu.memory_space<vmem>>, %arg5: memref<1x8x256xf32, #tpu.memory_space<vmem>>) attributes {dimension_semantics = [#tpu.dimension_semantics<parallel>, #tpu.dimension_semantics<parallel>], iteration_bounds = array<i64: 2, 1>, scalar_prefetch = 0 : i64, scratch_operands = 0 : i64, tpu.core_type = #tpu.core_type<tc>, window_params = [{transform_indices = @transform_0, window_bounds = array<i64: 1, 4, 256>}, {pipeline_mode = #tpu.pipeline_mode<synchronous>, transform_indices = @transform_1, window_bounds = array<i64: 8, 4>}, {pipeline_mode = #tpu.pipeline_mode<synchronous>, transform_indices = @transform_2, window_bounds = array<i64: 8, 1>}, {transform_indices = @transform_3, window_bounds = array<i64: 1, 8, 256>}]} {
    %c0 = arith.constant 0 : index
    %c0_0 = arith.constant 0 : index
    %0 = vector.load %arg3[%c0, %c0_0] : memref<8x4xf32, #tpu.memory_space<vmem>>, vector<8x4xf32>
    %c0_1 = arith.constant 0 : index
    %c0_2 = arith.constant 0 : index
    %1 = vector.load %arg4[%c0_1, %c0_2] : memref<8x1xf32, #tpu.memory_space<vmem>>, vector<8x1xf32>
    %c0_3 = arith.constant 0 : index
    %c0_4 = arith.constant 0 : index
    %c0_5 = arith.constant 0 : index
    %2 = vector.load %arg2[%c0_3, %c0_4, %c0_5] : memref<1x4x256xf32, #tpu.memory_space<vmem>>, vector<1x4x256xf32>
    %3 = vector.shape_cast %2 : vector<1x4x256xf32> to vector<4x256xf32>
    %cst = arith.constant dense<0.000000e+00> : vector<8x256xf32>
    %4 = tpu.matmul %0, %3, %cst {dimension_numbers = #tpu.dot_dimension_numbers<[1], [0], [0], [1], [0, 0, 1, 1], [], []>} : vector<8x4xf32>, vector<4x256xf32>, vector<8x256xf32> -> vector<8x256xf32>
    %5 = vector.broadcast %1 : vector<8x1xf32> to vector<8x256xf32>
    %6 = arith.addf %4, %5 : vector<8x256xf32>
    %c0_6 = arith.constant 0 : index
    %c0_7 = arith.constant 0 : index
    %c0_8 = arith.constant 0 : index
    %7 = vector.load %arg5[%c0_6, %c0_7, %c0_8] : memref<1x8x256xf32, #tpu.memory_space<vmem>>, vector<1x8x256xf32>
    %8 = vector.shape_cast %7 : vector<1x8x256xf32> to vector<8x256xf32>
    %9 = vector.shape_cast %6 : vector<8x256xf32> to vector<1x8x256xf32>
    tpu.vector_store %arg5[%c0_6, %c0_7, %c0_8], %9 {strides = array<i32>} : memref<1x8x256xf32, #tpu.memory_space<vmem>>, vector<1x8x256xf32>,
    return
  }
  func.func @transform_0(%arg0: i32, %arg1: i32) -> (i32, i32, i32) {
    %c0_i32 = arith.constant 0 : i32
    %c0_i32_0 = arith.constant 0 : i32
    return %arg0, %c0_i32, %arg1 : i32, i32, i32
  }
  func.func @transform_1(%arg0: i32, %arg1: i32) -> (i32, i32) {
    %c0_i32 = arith.constant 0 : i32
    %c0_i32_0 = arith.constant 0 : i32
    %c0_i32_1 = arith.constant 0 : i32
    return %c0_i32, %c0_i32_0 : i32, i32
  }
  func.func @transform_2(%arg0: i32, %arg1: i32) -> (i32, i32) {
    %c0_i32 = arith.constant 0 : i32
    %c0_i32_0 = arith.constant 0 : i32
    %c0_i32_1 = arith.constant 0 : i32
    return %c0_i32, %c0_i32_0 : i32, i32
  }
  func.func @transform_3(%arg0: i32, %arg1: i32) -> (i32, i32, i32) {
    %c0_i32 = arith.constant 0 : i32
    %c0_i32_0 = arith.constant 0 : i32
    return %arg0, %c0_i32, %arg1 : i32, i32, i32
  }
}

module attributes {stable_mosaic.version = 11 : i64} {
  func.func @_kernel(%arg0: i32, %arg1: i32, %arg2: memref<1x4x256xf32, #tpu.memory_space<vmem>>, %arg3: memref<8x4xf32, #tpu.memory_space<vmem>>, %arg4: memref<8x1xf32, #tpu.memory_space<vmem>>, %arg5: memref<1x8x256xf32, #tpu.memory_space<vmem>>) attributes {dimension_semantics = [#tpu.dimension_semantics<parallel>, #tpu.dimension_semantics<parallel>], iteration_bounds = array<i64: 2, 1>, scalar_prefetch = 0 : i64, scratch_operands = 0 : i64, tpu.core_type = #tpu.core_type<tc>, window_params = [{transform_indices = @transform_0, window_bounds = array<i64: 1, 4, 256>}, {pipeline_mode = #tpu.pipeline_mode<synchronous>, transform_indices = @transform_1, window_bounds = array<i64: 8, 4>}, {pipeline_mode = #tpu.pipeline_mode<synchronous>, transform_indices = @transform_2, window_bounds = array<i64: 8, 1>}, {transform_indices = @transform_3, window_bounds = array<i64: 1, 8, 256>}]} {
    %c0 = arith.constant 0 : index
    %c0_0 = arith.constant 0 : index
    %0 = vector.load %arg3[%c0, %c0_0] : memref<8x4xf32, #tpu.memory_space<vmem>>, vector<8x4xf32>
    %c0_1 = arith.constant 0 : index
    %c0_2 = arith.constant 0 : index
    %1 = vector.load %arg4[%c0_1, %c0_2] : memref<8x1xf32, #tpu.memory_space<vmem>>, vector<8x1xf32>
    %c0_3 = arith.constant 0 : index
    %c0_4 = arith.constant 0 : index
    %c0_5 = arith.constant 0 : index
    %2 = vector.load %arg2[%c0_3, %c0_4, %c0_5] : memref<1x4x256xf32, #tpu.memory_space<vmem>>, vector<1x4x256xf32>
    %3 = vector.shape_cast %2 : vector<1x4x256xf32> to vector<4x256xf32>
    %cst = arith.constant dense<0.000000e+00> : vector<8x256xf32>
    %4 = tpu.matmul %0, %3, %cst {dimension_numbers = #tpu.dot_dimension_numbers<[1], [0], [0], [1], [0, 0, 1, 1], [], []>} : vector<8x4xf32>, vector<4x256xf32>, vector<8x256xf32> -> vector<8x256xf32>
    %5 = vector.broadcast %1 : vector<8x1xf32> to vector<8x256xf32>
    %6 = arith.addf %4, %5 : vector<8x256xf32>
    %c0_6 = arith.constant 0 : index
    %c0_7 = arith.constant 0 : index
    %c0_8 = arith.constant 0 : index
    %7 = vector.load %arg5[%c0_6, %c0_7, %c0_8] : memref<1x8x256xf32, #tpu.memory_space<vmem>>, vector<1x8x256xf32>
    %8 = vector.shape_cast %7 : vector<1x8x256xf32> to vector<8x256xf32>
    %9 = vector.shape_cast %6 : vector<8x256xf32> to vector<1x8x256xf32>
    tpu.vector_store %arg5[%c0_6, %c0_7, %c0_8], %9 {strides = array<i32>} : memref<1x8x256xf32, #tpu.memory_space<vmem>>, vector<1x8x256xf32>,
    return
  }
  func.func @transform_0(%arg0: i32, %arg1: i32) -> (i32, i32, i32) {
    %c0_i32 = arith.constant 0 : i32
    %c0_i32_0 = arith.constant 0 : i32
    return %arg0, %c0_i32, %arg1 : i32, i32, i32
  }
  func.func @transform_1(%arg0: i32, %arg1: i32) -> (i32, i32) {
    %c0_i32 = arith.constant 0 : i32
    %c0_i32_0 = arith.constant 0 : i32
    %c0_i32_1 = arith.constant 0 : i32
    return %c0_i32, %c0_i32_0 : i32, i32
  }
  func.func @transform_2(%arg0: i32, %arg1: i32) -> (i32, i32) {
    %c0_i32 = arith.constant 0 : i32
    %c0_i32_0 = arith.constant 0 : i32
    %c0_i32_1 = arith.constant 0 : i32
    return %c0_i32, %c0_i32_0 : i32, i32
  }
  func.func @transform_3(%arg0: i32, %arg1: i32) -> (i32, i32, i32) {
    %c0_i32 = arith.constant 0 : i32
    %c0_i32_0 = arith.constant 0 : i32
    return %arg0, %c0_i32, %arg1 : i32, i32, i32
  }
}

</mosaic_0001>

<bundles_post_ra>
// kernel: linear_forward.1
= control target key start
LH: loop header
LB: loop body
LE: loop exit
PB: predicated region body
PF: predicated region fallthrough
CT: control target
= control target key end

     0   :  { %8 = vsyncpa [#allocation3], 0  ;;  %s999_s0 = inlined_call_operand.hbm [shape: f32[2,4,256], index: 0, kind: input, shape index: {}]   ;;  %s1000_s1 = inlined_call_operand.hbm [shape: f32[8,4], index: 1, kind: input, shape index: {}]   ;;  %s1001_s2 = inlined_call_operand.hbm [shape: f32[8,1], index: 2, kind: input, shape index: {}]   ;;  %s1002_s3 = inlined_call_operand.hbm [shape: f32[2,8,256], index: 3, kind: output, shape index: {}]  }
   0x1   :  { %10 = vsyncpa [#allocation3 + $0x1], 0 }
   0x2   :  { %11 = vsyncpa [#allocation6], 0 }
   0x3   :  { %12 = vsyncpa [#allocation4], 0 }
   0x4   :  { %14 = vsyncpa [#allocation4 + $0x1], 0  ;;  %s755_s12 = smov 0   ;;  %s757_s13 = smov 0  }
   0x5   :  { %s759_s14 = smov 0   ;;  %s761_s15 = smov 0  }
   0x6   :  { %s763_s16 = smov 0   ;;  %s765_s17 = smov 0  }
   0x7 LB: > { %s444_s18 = sadd.s32 4294967295, %s727_s17   ;;  %s445_s19 = sadd.s32 4294967294, %s727_s17   ;;  %s727_s17 = sphi %s765_s17, %s20_s17   ;;  %s723_s16 = sphi %s763_s16, %s1025_s16   ;;  %s719_s15 = sphi %s761_s15, %s1024_s15   ;;  %s715_s14 = sphi %s759_s14, %s1023_s14   ;;  %s711_s13 = sphi %s757_s13, %s1022_s13   ;;  %s707_s12 = sphi %s755_s12, %s1021_s12  }
   0x8   : > { %p54_p0 = scmp.ne.s32.totalorder %s711_s13, %s707_s12  ;;  %p789_p1 = scmp.eq.s32.totalorder %s444_s18, 0 }
   0x9   : > { %p793_p2 = scmp.eq.s32.totalorder %s444_s18, 1  ;;  %p128_p3 = scmp.eq.s32.totalorder %s445_s19, 1 }
   0xa   : > { %s1007_s20 = scalar_select %p789_p1, 1, 0 }
   0xb   : > { %s1008_s21 = scalar_select %p793_p2, 1, 0 }
   0xc   : > { %p799_p4 = por %p789_p1, %p54_p0  ;;  %p446_p5 = scmp.ge.s32.totalorder %s727_s17, 1 }
   0xd   : > { %p804_p6 = por %p128_p3, %p54_p0  ;;  %p135_p7 = scmp.lt.s32.totalorder %s727_s17, 3 }
   0xe   : > { %s1009_s22 = scalar_select %p799_p4, 1, 0 }
   0xf   : > { %s1010_s23 = scalar_select %p804_p6, 1, 0 }
  0x10   : > { %p809_p8 = pnand %p446_p5, %p135_p7  ;;  %s729_s25 = smov [#allocation5]  }
  0x11   : > { %s148_s26 = sshll.u32 %s729_s25, 4  ;;  %s730_s27 = smov [#allocation7]   ;;  %s149_s26 = int_to_ptr.vmem [resolvable:$true] %s148_s26 }
  0x12   : > { %s1011_s24 = scalar_select %p809_p8, 1, 0 }
  0x13   : > { %p480_p10 = pneg %p809_p8  ;;  %s159_s28 = sshll.u32 %s730_s27, 4  ;;  %s822_s28 = int_to_ptr.vmem [resolvable:$true] %s159_s28 }
  0x14   : > { %s555_s5 = scalar_lea.hbm %s1000_s1, 128 }
  0x15   : > { %p818_p11 = pnand %p480_p10, %p789_p1  ;;  %p556_p12 = scmp.ne.s32.totalorder %s1000_s1, %s555_s5 }
  0x16   : > { %p562_p5 = scmp.lt.u32.totalorder %s555_s5, %s1000_s1 }
  0x17   : > { %p557_p13 = pneg %p818_p11 }
  0x19   : > { %p558_p0 = pnand %p557_p13, %p556_p12 }
  0x1b   : > { %p559_p3 = pneg %p558_p0 }
  0x1d   : > { %p564_p7 = pnand %p562_p5, %p559_p3 }
  0x1f   : > { %567 = shalt.err (!%p564_p7)
}
  0x20   : > { %s568_s10 = scalar_lea.vmem %s149_s26, 128  ;;  %p576_p1 = scmp.lt.s32.totalorder %s149_s26, %s149_s26 }
  0x21   : > { %p569_p10 = scmp.ne.s32.totalorder %s149_s26, %s568_s10  ;;  %p577_p4 = scmp.lt.s32.totalorder %s568_s10, %s568_s10 }
  0x23   : > { %p571_p9 = pnand %p569_p10, %p557_p13  ;;  %p578_p8 = por %p577_p4, %p576_p1 }
  0x25   : > { %p572_p6 = pneg %p571_p9 }
  0x27   : > { %p579_p2 = pnand %p578_p8, %p572_p6 }
  0x29   : > { %582 = shalt.err (!%p579_p2)
}
  0x2a   : > { %483 = dma.hbm_to_vmem [thread:$0]  (!%p818_p11), %s1000_s1, 128, %s149_s26, [#allocation6]  }
  0x2b   : > { %s583_s27 = scalar_lea.hbm %s1001_s2, 128 }
  0x2c   : > { %p584_p9 = scmp.ne.s32.totalorder %s1001_s2, %s583_s27  ;;  %p590_p2 = scmp.lt.u32.totalorder %s583_s27, %s1001_s2 }
  0x2e   : > { %p586_p1 = pnand %p584_p9, %p557_p13 }
  0x30   : > { %p587_p4 = pneg %p586_p1 }
  0x32   : > { %p592_p6 = pnand %p590_p2, %p587_p4 }
  0x34   : > { %595 = shalt.err (!%p592_p6)
}
  0x35   : > { %s596_s26 = scalar_lea.vmem %s822_s28, 128  ;;  %p604_p3 = scmp.lt.s32.totalorder %s822_s28, %s822_s28 }
  0x36   : > { %p597_p8 = scmp.ne.s32.totalorder %s822_s28, %s596_s26  ;;  %p605_p5 = scmp.lt.s32.totalorder %s596_s26, %s596_s26 }
  0x38   : > { %p599_p12 = pnand %p597_p8, %p557_p13  ;;  %p606_p7 = por %p605_p5, %p604_p3 }
  0x3a   : > { %p600_p0 = pneg %p599_p12 }
  0x3c   : > { %p607_p10 = pnand %p606_p7, %p600_p0 }
  0x3e   : > { %610 = shalt.err (!%p607_p10)
}
  0x3f   : > { %486 = dma.hbm_to_vmem [thread:$0]  (!%p818_p11), %s1001_s2, 128, %s822_s28, [#allocation6]  }
  0x40   : > { %s32_s9 = sadd.s32 1, %s723_s16  ;;  %s41_s10 = sadd.s32 1, %s715_s14 }
  0x41   : > { %p34_p13 = scmp.ge.s32.totalorder %s32_s9, 2  ;;  %p48_p9 = scmp.ne.s32.totalorder %s715_s14, %s711_s13 }
  0x42   : > { %p49_p1 = scmp.eq.s32.totalorder %s727_s17, 0  ;;  %p497_p4 = scmp.lt.s32.totalorder %s727_s17, 2 }
  0x43   : > { %s1027_s9 = smov (%p34_p13, %s32_s9), 0  ;;  %p1013_p6 = scmp.ne.s32.totalorder %s1008_s21, 0 }
  0x44   : > { %p50_p2 = por %p49_p1, %p48_p9  ;;  %s36_s11 = ssub.s32 %s723_s16, %s1027_s9 }
  0x45   : > { %p881_p8 = por %p1013_p6, %p48_p9  ;;  %s170_s18 = sand.u32 1, %s715_s14  }
  0x46   : > { %p39_p12 = scmp.eq.s32.totalorder %s36_s11, 0  ;;  %s450_s28 = sshll.u32 %s170_s18, 3 }
  0x47   : > { %s466_s19 = sshll.u32 %s723_s16, 7  ;;  %s174_s21 = scalar_lea.vmem [#allocation2], %s450_s28 }
  0x48   : > { %s890_s25 = scalar_select %p39_p12, %s715_s14, %s41_s10  }
  0x49   : > { %s895_s4 = scalar_lea.hbm %s999_s0, %s466_s19  ;;  %s184_s5 = sshll.u32 %s174_s21, 4  ;;  %s903_s5 = int_to_ptr.vmem [resolvable:$true] %s184_s5 }
  0x4a   : > { %p899_p11 = pnand %p497_p4, %p50_p2  ;;  %s171_s26 = scalar_lea.sflag [#allocation3], %s170_s18 }
  0x4b   : > { %s611_s7 = scalar_lea.hbm %s895_s4, 128  ;;  %s616_s11 = scalar_lea.hbm %s999_s0, 256 }
  0x4c   : > { %p612_p0 = scmp.ne.s32.totalorder %s895_s4, %s611_s7  ;;  %p613_p3 = pneg %p899_p11 }
  0x4d   : > { %p617_p10 = scmp.lt.u32.totalorder %s895_s4, %s999_s0  ;;  %p618_p13 = scmp.lt.u32.totalorder %s616_s11, %s611_s7 }
  0x4e   : > { %p614_p5 = pnand %p613_p3, %p612_p0  ;;  %p620_p1 = scmp.lt.u32.totalorder %s611_s7, %s895_s4 }
  0x4f   : > { %p619_p9 = por %p618_p13, %p617_p10 }
  0x50   : > { %p615_p7 = pneg %p614_p5 }
  0x51   : > { %p621_p4 = por %p620_p1, %p619_p9 }
  0x53   : > { %p622_p2 = pnand %p621_p4, %p615_p7 }
  0x55   : > { %625 = shalt.err (!%p622_p2)
}
  0x56   : > { %s626_s18 = scalar_lea.vmem %s903_s5, 128  ;;  %s731_s27 = smov [#allocation2]  }
  0x57   : > { %p627_p6 = scmp.ne.s32.totalorder %s903_s5, %s626_s18  ;;  %s631_s30 = sshll.u32 %s731_s27, 4  ;;  %s632_s30 = int_to_ptr.vmem [resolvable:$false] %s631_s30 }
  0x58   : > { %s633_s21 = scalar_lea.vmem %s632_s30, 256  ;;  %p634_p5 = scmp.lt.s32.totalorder %s903_s5, %s632_s30 }
  0x59   : > { %p629_p12 = pnand %p627_p6, %p613_p3  ;;  %p635_p10 = scmp.lt.s32.totalorder %s633_s21, %s626_s18 }
  0x5b   : > { %p630_p0 = pneg %p629_p12  ;;  %p636_p13 = por %p635_p10, %p634_p5 }
  0x5d   : > { %p637_p9 = pnand %p636_p13, %p630_p0 }
  0x5f   : > { %640 = shalt.err (!%p637_p9)
}
  0x60   : > { %490 = dma.hbm_to_vmem [thread:$0]  (!%p899_p11), %s895_s4, 128, %s903_s5, %s171_s26  }
  0x61   : > { %p1016_p7 = scmp.ne.s32.totalorder %s1011_s24, 0 }
  0x62   : > { %s933_s7 = sand.u32 (!%p1016_p7), 1, %s711_s13   ;;  %p1017_p3 = scmp.ne.s32.totalorder (!%p1016_p7), %s1009_s22, 0 }
  0x63   : > { %193 = sbr.rel (%p1016_p7) target bundleno = 344 (0x158), region = 32  ;;  %s454_s8 = sshll.u32 (!%p1016_p7), %s933_s7, 3 }
  0x64   : > { %s196_s10 = scalar_lea.sflag (!%p1016_p7), [#allocation3], %s933_s7  ;;  %s199_s11 = scalar_lea.vmem (!%p1016_p7), [#allocation2], %s454_s8 }
  0x6a   : > { %694 = dma.done.wait (%p1017_p3), %s196_s10, 128  }
  0x6b   : > { %696 = vsyncadd (%p1017_p3), %s196_s10, 4294967168  ;;  %p1018_p1 = scmp.ne.s32.totalorder %s1007_s20, 0 }
  0x6d   : > { %698 = dma.done.wait (%p1018_p1), [#allocation6], 256  }
  0x6e   : > { %700 = vsyncadd (%p1018_p1), [#allocation6], 4294967040  ;;  %v732_v0 = vmov 0.0   ;;  %v733_v1 = vmov 0   ;;  %v234_v2 = vld [vmem:[%s199_s11] sm:$0xff]  ;;  %vm246_vm0 = vcmask 1043456  }
  0x6f   : > { %315 = vmatprep.mubr.f32.mxu0 %v732_v0  ;;  %553 = vset.pattern.permute.xlu0 %v733_v1  ;;  %v233_v3 = vld [vmem:[#allocation7] sm:$0xff]  ;;  %v241_v4 = vcombine.high %v234_v2, %v234_v2  ;;  %v232_v5 = vld [vmem:[#allocation5] sm:$0xff]  ;;  %vm242_vm1 = vcmask 31744   ;;  %s457_s22 = sshll.u32 %s933_s7, 4  ;;  %s467_s20 = sshll.u32 %s719_s15, 8 }
  0x70   : > { %237 = vperm.xlu0 %553, %v233_v3   ;;  %s229_s24 = scalar_lea.vmem [#allocation8], %s457_s22  ;;  %s950_s26 = scalar_lea.hbm %s1002_s3, %s467_s20 }
  0x71   : > { %458 = vmatprep.subr.msk.mxu0 %vm246_vm0, %v241_v4  ;;  %s341_s4 = sshll.u32 %s229_s24, 4  ;;  %s325_s28 = scalar_lea.sflag [#allocation4], %s933_s7  ;;  %s952_s4 = int_to_ptr.vmem [resolvable:$true] %s341_s4 }
  0x72   : > { %459 = vmatpush1.msk.msra.mxu0 %vm246_vm0, %v234_v2  ;;  %s641_s15 = scalar_lea.vmem %s952_s4, 256  ;;  %s734_s19 = smov [#allocation8]  }
  0x73   : > { %460 = vmatmul.mubr.msk.f32.vlgmr.msra.gmra.mrb[0].mxu0 %vm242_vm1, %v232_v5  ;;  %p642_p11 = scmp.ne.s32.totalorder %s952_s4, %s641_s15  ;;  %s645_s18 = sshll.u32 %s734_s19, 4  ;;  %s646_s18 = int_to_ptr.vmem [resolvable:$false] %s645_s18 }
  0x74   : > { %s647_s27 = scalar_lea.vmem %s646_s18, 512  ;;  %p648_p6 = scmp.lt.s32.totalorder %s952_s4, %s646_s18 }
  0x75   : > { %p643_p4 = pnand %p642_p11, %p881_p8  ;;  %p649_p12 = scmp.lt.s32.totalorder %s647_s27, %s641_s15 }
  0x77   : > { %p644_p2 = pneg %p643_p4  ;;  %p650_p0 = por %p649_p12, %p648_p6 }
  0x79   : > { %p651_p5 = pnand %p650_p0, %p644_p2 }
  0xef   : > { %v238_v6 = vpop.permute.xlu0 %237 }
 0x146   : > { %v317_v7 = vpop.f32.mrb[0].mxu0 }
 0x147   : > { %v318_v8 = vadd.f32 %v317_v7, %v238_v6  ;;  %v319_v9 = vpop.f32.mrb[1].mxu0 }
 0x148   : > { %v320_v10 = vadd.f32 %v319_v9, %v238_v6 }
 0x149   : > { %322 = vst [vmem:[%s229_s24] sm:$0xff] %v318_v8 }
 0x14a   : > { %323 = vst [vmem:[%s229_s24 + $0x8] sm:$0xff] %v320_v10 }
 0x14b   : > { %654 = shalt.err (!%p651_p5)
}
 0x14c   : > { %s655_s30 = scalar_lea.hbm %s950_s26, 256  ;;  %s659_s8 = scalar_lea.hbm %s1002_s3, 512 }
 0x14d   : > { %p656_p10 = scmp.ne.s32.totalorder %s950_s26, %s655_s30  ;;  %p660_p7 = scmp.lt.u32.totalorder %s950_s26, %s1002_s3 }
 0x14e   : > { %p661_p3 = scmp.lt.u32.totalorder %s659_s8, %s655_s30  ;;  %p663_p11 = scmp.lt.u32.totalorder %s655_s30, %s950_s26 }
 0x14f   : > { %p657_p13 = pnand %p656_p10, %p881_p8 }
 0x150   : > { %p662_p1 = por %p661_p3, %p660_p7 }
 0x151   : > { %p658_p9 = pneg %p657_p13 }
 0x152   : > { %p664_p4 = por %p663_p11, %p662_p1 }
 0x154   : > { %p665_p2 = pnand %p664_p4, %p658_p9 }
 0x156   : > { %668 = shalt.err (!%p665_p2)
}
 0x157   : > { %478 = dma.vmem_to_hbm [thread:$0]  (%p881_p8), %s952_s4, 256, %s950_s26, %s325_s28  }
 0x158 PF: > { %s353_s22 = sand.u32 1, %s707_s12   ;;  %p1019_p6 = scmp.ne.s32.totalorder %s1010_s23, 0 }
 0x159   : > { %p1020_p12 = scmp.ge.s32.totalorder %s727_s17, 2  ;;  %s354_s20 = scalar_lea.sflag [#allocation4], %s353_s22 }
 0x15b   : > { %p492_p0 = pnand %p1020_p12, %p1019_p6 }
 0x15d   : > { %702 = dma.done.wait (!%p492_p0), %s354_s20, 256  }
 0x15e   : > { %704 = vsyncadd (!%p492_p0), %s354_s20, 4294967040  ;;  %s20_s17 = sadd.s32 1, %s727_s17   ;;  %s1021_s12 = smov %s711_s13 }
 0x15f   : > { %p17_p5 = scmp.ge.s32.totalorder %s20_s17, 4   ;;  %s1022_s13 = smov %s715_s14 }
 0x160   : > { %s1023_s14 = smov %s890_s25  ;;  %s1024_s15 = smov %s723_s16 }
 0x161   : > { %s1025_s16 = smov %s1027_s9  ;;  %19 = sbr.rel (!%p17_p5) target bundleno = 7 (0x7), region = 85 }
 0x168   :  { %359 = vsyncpa [#allocation3], 1 }
 0x169   :  { %361 = vsyncpa [#allocation3 + $0x1], 1 }
 0x16a   :  { %362 = vsyncpa [#allocation6], 1 }
 0x16b   :  { %363 = vsyncpa [#allocation4], 1 }
 0x16c   :  { %365 = vsyncpa [#allocation4 + $0x1], 1 }

// kernel: linear_forward.1
= control target key start
LH: loop header
LB: loop body
LE: loop exit
PB: predicated region body
PF: predicated region fallthrough
CT: control target
= control target key end

     0   :  { %8 = vsyncpa [#allocation3], 0  ;;  %s999_s0 = inlined_call_operand.hbm [shape: f32[2,4,256], index: 0, kind: input, shape index: {}]   ;;  %s1000_s1 = inlined_call_operand.hbm [shape: f32[8,4], index: 1, kind: input, shape index: {}]   ;;  %s1001_s2 = inlined_call_operand.hbm [shape: f32[8,1], index: 2, kind: input, shape index: {}]   ;;  %s1002_s3 = inlined_call_operand.hbm [shape: f32[2,8,256], index: 3, kind: output, shape index: {}]  }
   0x1   :  { %10 = vsyncpa [#allocation3 + $0x1], 0 }
   0x2   :  { %11 = vsyncpa [#allocation6], 0 }
   0x3   :  { %12 = vsyncpa [#allocation4], 0 }
   0x4   :  { %14 = vsyncpa [#allocation4 + $0x1], 0  ;;  %s755_s12 = smov 0   ;;  %s757_s13 = smov 0  }
   0x5   :  { %s759_s14 = smov 0   ;;  %s761_s15 = smov 0  }
   0x6   :  { %s763_s16 = smov 0   ;;  %s765_s17 = smov 0  }
   0x7 LB: > { %s444_s18 = sadd.s32 4294967295, %s727_s17   ;;  %s445_s19 = sadd.s32 4294967294, %s727_s17   ;;  %s727_s17 = sphi %s765_s17, %s20_s17   ;;  %s723_s16 = sphi %s763_s16, %s1025_s16   ;;  %s719_s15 = sphi %s761_s15, %s1024_s15   ;;  %s715_s14 = sphi %s759_s14, %s1023_s14   ;;  %s711_s13 = sphi %s757_s13, %s1022_s13   ;;  %s707_s12 = sphi %s755_s12, %s1021_s12  }
   0x8   : > { %p54_p0 = scmp.ne.s32.totalorder %s711_s13, %s707_s12  ;;  %p789_p1 = scmp.eq.s32.totalorder %s444_s18, 0 }
   0x9   : > { %p793_p2 = scmp.eq.s32.totalorder %s444_s18, 1  ;;  %p128_p3 = scmp.eq.s32.totalorder %s445_s19, 1 }
   0xa   : > { %s1007_s20 = scalar_select %p789_p1, 1, 0 }
   0xb   : > { %s1008_s21 = scalar_select %p793_p2, 1, 0 }
   0xc   : > { %p799_p4 = por %p789_p1, %p54_p0  ;;  %p446_p5 = scmp.ge.s32.totalorder %s727_s17, 1 }
   0xd   : > { %p804_p6 = por %p128_p3, %p54_p0  ;;  %p135_p7 = scmp.lt.s32.totalorder %s727_s17, 3 }
   0xe   : > { %s1009_s22 = scalar_select %p799_p4, 1, 0 }
   0xf   : > { %s1010_s23 = scalar_select %p804_p6, 1, 0 }
  0x10   : > { %p809_p8 = pnand %p446_p5, %p135_p7  ;;  %s729_s25 = smov [#allocation5]  }
  0x11   : > { %s148_s26 = sshll.u32 %s729_s25, 4  ;;  %s730_s27 = smov [#allocation7]   ;;  %s149_s26 = int_to_ptr.vmem [resolvable:$true] %s148_s26 }
  0x12   : > { %s1011_s24 = scalar_select %p809_p8, 1, 0 }
  0x13   : > { %p480_p10 = pneg %p809_p8  ;;  %s159_s28 = sshll.u32 %s730_s27, 4  ;;  %s822_s28 = int_to_ptr.vmem [resolvable:$true] %s159_s28 }
  0x14   : > { %s555_s5 = scalar_lea.hbm %s1000_s1, 128 }
  0x15   : > { %p818_p11 = pnand %p480_p10, %p789_p1  ;;  %p556_p12 = scmp.ne.s32.totalorder %s1000_s1, %s555_s5 }
  0x16   : > { %p562_p5 = scmp.lt.u32.totalorder %s555_s5, %s1000_s1 }
  0x17   : > { %p557_p13 = pneg %p818_p11 }
  0x19   : > { %p558_p0 = pnand %p557_p13, %p556_p12 }
  0x1b   : > { %p559_p3 = pneg %p558_p0 }
  0x1d   : > { %p564_p7 = pnand %p562_p5, %p559_p3 }
  0x1f   : > { %567 = shalt.err (!%p564_p7)
}
  0x20   : > { %s568_s10 = scalar_lea.vmem %s149_s26, 128  ;;  %p576_p1 = scmp.lt.s32.totalorder %s149_s26, %s149_s26 }
  0x21   : > { %p569_p10 = scmp.ne.s32.totalorder %s149_s26, %s568_s10  ;;  %p577_p4 = scmp.lt.s32.totalorder %s568_s10, %s568_s10 }
  0x23   : > { %p571_p9 = pnand %p569_p10, %p557_p13  ;;  %p578_p8 = por %p577_p4, %p576_p1 }
  0x25   : > { %p572_p6 = pneg %p571_p9 }
  0x27   : > { %p579_p2 = pnand %p578_p8, %p572_p6 }
  0x29   : > { %582 = shalt.err (!%p579_p2)
}
  0x2a   : > { %483 = dma.hbm_to_vmem [thread:$0]  (!%p818_p11), %s1000_s1, 128, %s149_s26, [#allocation6]  }
  0x2b   : > { %s583_s27 = scalar_lea.hbm %s1001_s2, 128 }
  0x2c   : > { %p584_p9 = scmp.ne.s32.totalorder %s1001_s2, %s583_s27  ;;  %p590_p2 = scmp.lt.u32.totalorder %s583_s27, %s1001_s2 }
  0x2e   : > { %p586_p1 = pnand %p584_p9, %p557_p13 }
  0x30   : > { %p587_p4 = pneg %p586_p1 }
  0x32   : > { %p592_p6 = pnand %p590_p2, %p587_p4 }
  0x34   : > { %595 = shalt.err (!%p592_p6)
}
  0x35   : > { %s596_s26 = scalar_lea.vmem %s822_s28, 128  ;;  %p604_p3 = scmp.lt.s32.totalorder %s822_s28, %s822_s28 }
  0x36   : > { %p597_p8 = scmp.ne.s32.totalorder %s822_s28, %s596_s26  ;;  %p605_p5 = scmp.lt.s32.totalorder %s596_s26, %s596_s26 }
  0x38   : > { %p599_p12 = pnand %p597_p8, %p557_p13  ;;  %p606_p7 = por %p605_p5, %p604_p3 }
  0x3a   : > { %p600_p0 = pneg %p599_p12 }
  0x3c   : > { %p607_p10 = pnand %p606_p7, %p600_p0 }
  0x3e   : > { %610 = shalt.err (!%p607_p10)
}
  0x3f   : > { %486 = dma.hbm_to_vmem [thread:$0]  (!%p818_p11), %s1001_s2, 128, %s822_s28, [#allocation6]  }
  0x40   : > { %s32_s9 = sadd.s32 1, %s723_s16  ;;  %s41_s10 = sadd.s32 1, %s715_s14 }
  0x41   : > { %p34_p13 = scmp.ge.s32.totalorder %s32_s9, 2  ;;  %p48_p9 = scmp.ne.s32.totalorder %s715_s14, %s711_s13 }
  0x42   : > { %p49_p1 = scmp.eq.s32.totalorder %s727_s17, 0  ;;  %p497_p4 = scmp.lt.s32.totalorder %s727_s17, 2 }
  0x43   : > { %s1027_s9 = smov (%p34_p13, %s32_s9), 0  ;;  %p1013_p6 = scmp.ne.s32.totalorder %s1008_s21, 0 }
  0x44   : > { %p50_p2 = por %p49_p1, %p48_p9  ;;  %s36_s11 = ssub.s32 %s723_s16, %s1027_s9 }
  0x45   : > { %p881_p8 = por %p1013_p6, %p48_p9  ;;  %s170_s18 = sand.u32 1, %s715_s14  }
  0x46   : > { %p39_p12 = scmp.eq.s32.totalorder %s36_s11, 0  ;;  %s450_s28 = sshll.u32 %s170_s18, 3 }
  0x47   : > { %s466_s19 = sshll.u32 %s723_s16, 7  ;;  %s174_s21 = scalar_lea.vmem [#allocation2], %s450_s28 }
  0x48   : > { %s890_s25 = scalar_select %p39_p12, %s715_s14, %s41_s10  }
  0x49   : > { %s895_s4 = scalar_lea.hbm %s999_s0, %s466_s19  ;;  %s184_s5 = sshll.u32 %s174_s21, 4  ;;  %s903_s5 = int_to_ptr.vmem [resolvable:$true] %s184_s5 }
  0x4a   : > { %p899_p11 = pnand %p497_p4, %p50_p2  ;;  %s171_s26 = scalar_lea.sflag [#allocation3], %s170_s18 }
  0x4b   : > { %s611_s7 = scalar_lea.hbm %s895_s4, 128  ;;  %s616_s11 = scalar_lea.hbm %s999_s0, 256 }
  0x4c   : > { %p612_p0 = scmp.ne.s32.totalorder %s895_s4, %s611_s7  ;;  %p613_p3 = pneg %p899_p11 }
  0x4d   : > { %p617_p10 = scmp.lt.u32.totalorder %s895_s4, %s999_s0  ;;  %p618_p13 = scmp.lt.u32.totalorder %s616_s11, %s611_s7 }
  0x4e   : > { %p614_p5 = pnand %p613_p3, %p612_p0  ;;  %p620_p1 = scmp.lt.u32.totalorder %s611_s7, %s895_s4 }
  0x4f   : > { %p619_p9 = por %p618_p13, %p617_p10 }
  0x50   : > { %p615_p7 = pneg %p614_p5 }
  0x51   : > { %p621_p4 = por %p620_p1, %p619_p9 }
  0x53   : > { %p622_p2 = pnand %p621_p4, %p615_p7 }
  0x55   : > { %625 = shalt.err (!%p622_p2)
}
  0x56   : > { %s626_s18 = scalar_lea.vmem %s903_s5, 128  ;;  %s731_s27 = smov [#allocation2]  }
  0x57   : > { %p627_p6 = scmp.ne.s32.totalorder %s903_s5, %s626_s18  ;;  %s631_s30 = sshll.u32 %s731_s27, 4  ;;  %s632_s30 = int_to_ptr.vmem [resolvable:$false] %s631_s30 }
  0x58   : > { %s633_s21 = scalar_lea.vmem %s632_s30, 256  ;;  %p634_p5 = scmp.lt.s32.totalorder %s903_s5, %s632_s30 }
  0x59   : > { %p629_p12 = pnand %p627_p6, %p613_p3  ;;  %p635_p10 = scmp.lt.s32.totalorder %s633_s21, %s626_s18 }
  0x5b   : > { %p630_p0 = pneg %p629_p12  ;;  %p636_p13 = por %p635_p10, %p634_p5 }
  0x5d   : > { %p637_p9 = pnand %p636_p13, %p630_p0 }
  0x5f   : > { %640 = shalt.err (!%p637_p9)
}
  0x60   : > { %490 = dma.hbm_to_vmem [thread:$0]  (!%p899_p11), %s895_s4, 128, %s903_s5, %s171_s26  }
  0x61   : > { %p1016_p7 = scmp.ne.s32.totalorder %s1011_s24, 0 }
  0x62   : > { %s933_s7 = sand.u32 (!%p1016_p7), 1, %s711_s13   ;;  %p1017_p3 = scmp.ne.s32.totalorder (!%p1016_p7), %s1009_s22, 0 }
  0x63   : > { %193 = sbr.rel (%p1016_p7) target bundleno = 344 (0x158), region = 32  ;;  %s454_s8 = sshll.u32 (!%p1016_p7), %s933_s7, 3 }
  0x64   : > { %s196_s10 = scalar_lea.sflag (!%p1016_p7), [#allocation3], %s933_s7  ;;  %s199_s11 = scalar_lea.vmem (!%p1016_p7), [#allocation2], %s454_s8 }
  0x6a   : > { %694 = dma.done.wait (%p1017_p3), %s196_s10, 128  }
  0x6b   : > { %696 = vsyncadd (%p1017_p3), %s196_s10, 4294967168  ;;  %p1018_p1 = scmp.ne.s32.totalorder %s1007_s20, 0 }
  0x6d   : > { %698 = dma.done.wait (%p1018_p1), [#allocation6], 256  }
  0x6e   : > { %700 = vsyncadd (%p1018_p1), [#allocation6], 4294967040  ;;  %v732_v0 = vmov 0.0   ;;  %v733_v1 = vmov 0   ;;  %v234_v2 = vld [vmem:[%s199_s11] sm:$0xff]  ;;  %vm246_vm0 = vcmask 1043456  }
  0x6f   : > { %315 = vmatprep.mubr.f32.mxu0 %v732_v0  ;;  %553 = vset.pattern.permute.xlu0 %v733_v1  ;;  %v233_v3 = vld [vmem:[#allocation7] sm:$0xff]  ;;  %v241_v4 = vcombine.high %v234_v2, %v234_v2  ;;  %v232_v5 = vld [vmem:[#allocation5] sm:$0xff]  ;;  %vm242_vm1 = vcmask 31744   ;;  %s457_s22 = sshll.u32 %s933_s7, 4  ;;  %s467_s20 = sshll.u32 %s719_s15, 8 }
  0x70   : > { %237 = vperm.xlu0 %553, %v233_v3   ;;  %s229_s24 = scalar_lea.vmem [#allocation8], %s457_s22  ;;  %s950_s26 = scalar_lea.hbm %s1002_s3, %s467_s20 }
  0x71   : > { %458 = vmatprep.subr.msk.mxu0 %vm246_vm0, %v241_v4  ;;  %s341_s4 = sshll.u32 %s229_s24, 4  ;;  %s325_s28 = scalar_lea.sflag [#allocation4], %s933_s7  ;;  %s952_s4 = int_to_ptr.vmem [resolvable:$true] %s341_s4 }
  0x72   : > { %459 = vmatpush1.msk.msra.mxu0 %vm246_vm0, %v234_v2  ;;  %s641_s15 = scalar_lea.vmem %s952_s4, 256  ;;  %s734_s19 = smov [#allocation8]  }
  0x73   : > { %460 = vmatmul.mubr.msk.f32.vlgmr.msra.gmra.mrb[0].mxu0 %vm242_vm1, %v232_v5  ;;  %p642_p11 = scmp.ne.s32.totalorder %s952_s4, %s641_s15  ;;  %s645_s18 = sshll.u32 %s734_s19, 4  ;;  %s646_s18 = int_to_ptr.vmem [resolvable:$false] %s645_s18 }
  0x74   : > { %s647_s27 = scalar_lea.vmem %s646_s18, 512  ;;  %p648_p6 = scmp.lt.s32.totalorder %s952_s4, %s646_s18 }
  0x75   : > { %p643_p4 = pnand %p642_p11, %p881_p8  ;;  %p649_p12 = scmp.lt.s32.totalorder %s647_s27, %s641_s15 }
  0x77   : > { %p644_p2 = pneg %p643_p4  ;;  %p650_p0 = por %p649_p12, %p648_p6 }
  0x79   : > { %p651_p5 = pnand %p650_p0, %p644_p2 }
  0xef   : > { %v238_v6 = vpop.permute.xlu0 %237 }
 0x146   : > { %v317_v7 = vpop.f32.mrb[0].mxu0 }
 0x147   : > { %v318_v8 = vadd.f32 %v317_v7, %v238_v6  ;;  %v319_v9 = vpop.f32.mrb[1].mxu0 }
 0x148   : > { %v320_v10 = vadd.f32 %v319_v9, %v238_v6 }
 0x149   : > { %322 = vst [vmem:[%s229_s24] sm:$0xff] %v318_v8 }
 0x14a   : > { %323 = vst [vmem:[%s229_s24 + $0x8] sm:$0xff] %v320_v10 }
 0x14b   : > { %654 = shalt.err (!%p651_p5)
}
 0x14c   : > { %s655_s30 = scalar_lea.hbm %s950_s26, 256  ;;  %s659_s8 = scalar_lea.hbm %s1002_s3, 512 }
 0x14d   : > { %p656_p10 = scmp.ne.s32.totalorder %s950_s26, %s655_s30  ;;  %p660_p7 = scmp.lt.u32.totalorder %s950_s26, %s1002_s3 }
 0x14e   : > { %p661_p3 = scmp.lt.u32.totalorder %s659_s8, %s655_s30  ;;  %p663_p11 = scmp.lt.u32.totalorder %s655_s30, %s950_s26 }
 0x14f   : > { %p657_p13 = pnand %p656_p10, %p881_p8 }
 0x150   : > { %p662_p1 = por %p661_p3, %p660_p7 }
 0x151   : > { %p658_p9 = pneg %p657_p13 }
 0x152   : > { %p664_p4 = por %p663_p11, %p662_p1 }
 0x154   : > { %p665_p2 = pnand %p664_p4, %p658_p9 }
 0x156   : > { %668 = shalt.err (!%p665_p2)
}
 0x157   : > { %478 = dma.vmem_to_hbm [thread:$0]  (%p881_p8), %s952_s4, 256, %s950_s26, %s325_s28  }
 0x158 PF: > { %s353_s22 = sand.u32 1, %s707_s12   ;;  %p1019_p6 = scmp.ne.s32.totalorder %s1010_s23, 0 }
 0x159   : > { %p1020_p12 = scmp.ge.s32.totalorder %s727_s17, 2  ;;  %s354_s20 = scalar_lea.sflag [#allocation4], %s353_s22 }
 0x15b   : > { %p492_p0 = pnand %p1020_p12, %p1019_p6 }
 0x15d   : > { %702 = dma.done.wait (!%p492_p0), %s354_s20, 256  }
 0x15e   : > { %704 = vsyncadd (!%p492_p0), %s354_s20, 4294967040  ;;  %s20_s17 = sadd.s32 1, %s727_s17   ;;  %s1021_s12 = smov %s711_s13 }
 0x15f   : > { %p17_p5 = scmp.ge.s32.totalorder %s20_s17, 4   ;;  %s1022_s13 = smov %s715_s14 }
 0x160   : > { %s1023_s14 = smov %s890_s25  ;;  %s1024_s15 = smov %s723_s16 }
 0x161   : > { %s1025_s16 = smov %s1027_s9  ;;  %19 = sbr.rel (!%p17_p5) target bundleno = 7 (0x7), region = 85 }
 0x168   :  { %359 = vsyncpa [#allocation3], 1 }
 0x169   :  { %361 = vsyncpa [#allocation3 + $0x1], 1 }
 0x16a   :  { %362 = vsyncpa [#allocation6], 1 }
 0x16b   :  { %363 = vsyncpa [#allocation4], 1 }
 0x16c   :  { %365 = vsyncpa [#allocation4 + $0x1], 1 }

</bundles_post_ra>
